<compile_context>
chip_gen: v7x
topology: tpu7x:2x2x1
jax: 0.10.0
libtpu: 0.0.40
codegen_flags: <defaults>
</compile_context>

<pallas_src>
import math

import jax
import jax.numpy as jnp
from jax.experimental import pallas as pl
from jax.experimental.pallas import tpu as pltpu


def _round_up(v, m):
    return ((v + m - 1) // m) * m


def _cdiv(a, b):
    return (a + b - 1) // b


def _vmem_budget_bytes():
    """Per-generation VMEM budget with compiler headroom.

    v5e/v6e (128 MiB VMEM) -> ~100 MiB; v7x (64 MiB per TC) -> ~50 MiB.
    Falls back to a conservative 64 MiB capacity if the query fails.
    """
    cap = 64 << 20
    try:
        info = pltpu.get_tpu_info()
        cap = int(getattr(info, "vmem_capacity_bytes", cap))
    except Exception:
        pass
    budget = min(int(cap * 0.78), cap - (8 << 20), 112 << 20)
    return max(budget, 16 << 20)


def _weight_spec(shape, index_map, extra_buffering):
    """Streamed-weight BlockSpec; optionally 3-deep buffered to hide DMA jitter."""
    if extra_buffering and hasattr(pl, "Buffered"):
        try:
            return pl.BlockSpec(shape, index_map, pipeline_mode=pl.Buffered(3))
        except TypeError:
            pass
    return pl.BlockSpec(shape, index_map)


def _make_ffn_kernel(tk_eff, weights_resident, acc_in_out):
    """Kernel over grid (row_tile i [parallel], dff_tile k [arbitrary])."""

    def kernel(x_ref, w1_ref, b1_ref, w2_ref, b2_ref, o_ref, *scratch):
        k = pl.program_id(1)
        acc_ref = o_ref if acc_in_out else scratch[0]

        @pl.when(k == 0)
        def _init():
            acc_ref[...] = jnp.zeros_like(acc_ref)

        if weights_resident:
            # Whole padded weights live in VMEM; slice this dff tile out of them.
            kk = pl.multiple_of(k * tk_eff, tk_eff)
            w1_t = w1_ref[:, pl.ds(kk, tk_eff)]
            b1_t = b1_ref[:, pl.ds(kk, tk_eff)]
            w2_t = w2_ref[pl.ds(kk, tk_eff), :]
        else:
            w1_t = w1_ref[...]
            b1_t = b1_ref[...]
            w2_t = w2_ref[...]

        # First matmul on the MXU with f32 accumulation; bias + ReLU in f32.
        h = jnp.dot(x_ref[...], w1_t, preferred_element_type=jnp.float32)
        h = jnp.maximum(h + b1_t, 0.0)

        # Partial second matmul for this dff tile.  Keep the `+=` form so v7x
        # lowers it to in-place MRB accumulation (no extra VPU pass).
        acc_ref[...] += jnp.dot(h.astype(w2_t.dtype), w2_t,
                                preferred_element_type=jnp.float32)

        @pl.when(k == pl.num_programs(1) - 1)
        def _finalize():
            if acc_in_out:
                o_ref[...] += b2_ref[...]
            else:
                o_ref[...] = (acc_ref[...] + b2_ref[...]).astype(o_ref.dtype)

    return kernel


def prepare_ffn_params(w1, b1, w2, b2, *, compute_dtype=jnp.bfloat16, tk=512):
    """Pad + cast the weights ONCE (hoist this out of any per-step loop).

    W1: (d_model, dff), W2: (dff, d_model).  Dims are padded with zeros to
    multiples of 256 (exact math; MXU-friendly on v6e/v7x), weights cast to
    `compute_dtype`, biases kept in f32.
    """
    d_model, dff = w1.shape
    assert w2.shape == (dff, d_model)
    d_pad = _round_up(d_model, 256)
    dff_pad = _round_up(dff, 256)
    tk = _round_up(int(tk), 256)
    tk_eff = min(tk, dff_pad)
    if dff_pad % tk_eff != 0:
        tk_eff = 256  # 256 always divides dff_pad

    w1_p = jnp.pad(w1, ((0, d_pad - d_model), (0, dff_pad - dff))).astype(compute_dtype)
    w2_p = jnp.pad(w2, ((0, dff_pad - dff), (0, d_pad - d_model))).astype(compute_dtype)
    b1_p = jnp.pad(b1, (0, dff_pad - dff)).astype(jnp.float32).reshape(1, dff_pad)
    b2_p = jnp.pad(b2, (0, d_pad - d_model)).astype(jnp.float32).reshape(1, d_pad)

    return dict(w1=w1_p, b1=b1_p, w2=w2_p, b2=b2_p,
                d_model=d_model, dff=dff, d_pad=d_pad, dff_pad=dff_pad,
                tk=tk_eff, compute_dtype=compute_dtype)


def ffn_apply(x, params, *, tm=None, weights_resident=None):
    """Apply the FFN.  x: (..., d_model); params from prepare_ffn_params()."""
    cdt = params["compute_dtype"]
    d_model, dff = params["d_model"], params["dff"]
    d_pad, dff_pad = params["d_pad"], params["dff_pad"]
    tk_eff = params["tk"]
    w1_p, b1_p, w2_p, b2_p = params["w1"], params["b1"], params["w2"], params["b2"]

    assert x.shape[-1] == d_model
    lead = x.shape[:-1]
    N = int(math.prod(lead)) if lead else 1
    out_dtype = x.dtype
    acc_in_out = (out_dtype == jnp.float32)   # accumulate straight into o_ref

    cbytes = jnp.dtype(cdt).itemsize
    obytes = jnp.dtype(out_dtype).itemsize

    budget = _vmem_budget_bytes()
    target = int(budget * 0.9)                # leave margin for compiler temps

    # ---- weight residency: the biggest lever (kills per-row-tile re-streaming)
    full_w_vmem = 2 * 2 * d_pad * dff_pad * cbytes        # W1+W2, 2-deep buffers
    full_b_vmem = 2 * 2 * (dff_pad + d_pad) * 4
    if weights_resident is None:
        weights_resident = (full_w_vmem + full_b_vmem) <= budget // 2

    if weights_resident:
        fixed_vmem = full_w_vmem + full_b_vmem
    else:
        # Keep streamed weight tiles a sane fraction of the budget.
        if tk_eff > 256 and 2 * 2 * d_pad * tk_eff * cbytes > budget // 2:
            tk_eff = 256
        fixed_vmem = (2 * 2 * d_pad * tk_eff * cbytes      # W1/W2 tiles, 2-deep
                      + 2 * 2 * (tk_eff + d_pad) * 4)      # bias tiles
    n_k = dff_pad // tk_eff

    # ---- row tile: as large as the budget allows --------------------------
    per_row = (2 * d_pad * cbytes                  # x tile (double-buffered)
               + 2 * d_pad * obytes                # out tile (double-buffered)
               + (0 if acc_in_out else d_pad * 4)  # f32 accumulator scratch
               + tk_eff * (4 + cbytes))            # h intermediate (f32 + cast)
    tm_cap = max(8, (target - fixed_vmem) // per_row)
    tm_cap = (tm_cap // 256) * 256 if tm_cap >= 256 else (tm_cap // 8) * 8
    tm_req = tm if tm is not None else (1024 if weights_resident else 2048)
    tm_req = _round_up(int(tm_req), 8)
    n8 = _round_up(N, 8)
    tm_eff = max(8, min(tm_req, tm_cap, n8))

    # v7x has 2 TensorCores: when weights are resident (so splitting rows adds
    # no weight traffic) make sure the "parallel" row axis has >= 2 tiles.
    if weights_resident and n8 >= 512 and _cdiv(n8, tm_eff) == 1:
        tm_eff = _round_up(_cdiv(n8, 2), 8)

    n_pad = _cdiv(N, tm_eff) * tm_eff
    n_i = n_pad // tm_eff
    grid = (n_i, n_k)

    # ---- optional 3-deep buffering on streamed weight tiles ---------------
    extra_buf = False
    est_vmem = fixed_vmem + tm_eff * per_row
    if (not weights_resident) and n_k >= 3:
        third = 2 * d_pad * tk_eff * cbytes
        if est_vmem + third <= target:
            extra_buf = True

    # ---- pad / flatten the activation (per-call; weights were prepared once)
    x2d = jnp.pad(x.reshape(N, d_model),
                  ((0, n_pad - N), (0, d_pad - d_model))).astype(cdt)

    # ---- BlockSpecs --------------------------------------------------------
    x_spec = pl.BlockSpec((tm_eff, d_pad), lambda i, k: (i, 0))
    out_spec = pl.BlockSpec((tm_eff, d_pad), lambda i, k: (i, 0))
    if weights_resident:
        w1_spec = pl.BlockSpec((d_pad, dff_pad), lambda i, k: (0, 0))
        b1_spec = pl.BlockSpec((1, dff_pad), lambda i, k: (0, 0))
        w2_spec = pl.BlockSpec((dff_pad, d_pad), lambda i, k: (0, 0))
    else:
        w1_spec = _weight_spec((d_pad, tk_eff), lambda i, k: (0, k), extra_buf)
        b1_spec = pl.BlockSpec((1, tk_eff), lambda i, k: (0, k))
        w2_spec = _weight_spec((tk_eff, d_pad), lambda i, k: (k, 0), extra_buf)
    b2_spec = pl.BlockSpec((1, d_pad), lambda i, k: (0, 0))

    scratch_shapes = [] if acc_in_out else [pltpu.VMEM((tm_eff, d_pad), jnp.float32)]

    # ---- cost estimate with true HBM traffic -------------------------------
    flops = 4 * n_pad * d_pad * dff_pad
    weight_passes = 1 if weights_resident else n_i
    bytes_accessed = int(x2d.size * cbytes
                         + (w1_p.size + w2_p.size) * cbytes * weight_passes
                         + (b1_p.size + b2_p.size) * 4
                         + n_pad * d_pad * obytes)

    kernel = _make_ffn_kernel(tk_eff, weights_resident, acc_in_out)

    out2d = pl.pallas_call(
        kernel,
        out_shape=jax.ShapeDtypeStruct((n_pad, d_pad), out_dtype),
        grid_spec=pltpu.PrefetchScalarGridSpec(
            num_scalar_prefetch=0,
            grid=grid,
            in_specs=[x_spec, w1_spec, b1_spec, w2_spec, b2_spec],
            out_specs=out_spec,
            scratch_shapes=scratch_shapes,
        ),
        compiler_params=pltpu.CompilerParams(
            dimension_semantics=("parallel", "arbitrary"),
            vmem_limit_bytes=int(budget),
        ),
        cost_estimate=pl.CostEstimate(flops=int(flops), transcendentals=0,
                                      bytes_accessed=bytes_accessed),
    )(x2d, w1_p, b1_p, w2_p, b2_p)

    return out2d[:N, :d_model].reshape(*lead, d_model)


def pointwise_feed_forward(x, w1, b1, w2, b2, *, tm=None, tk=512,
                           compute_dtype=jnp.bfloat16, weights_resident=None):
    """Convenience wrapper.  For repeated calls, hoist prepare_ffn_params()
    out of the loop so weights are padded/cast once instead of per call."""
    params = prepare_ffn_params(w1, b1, w2, b2, compute_dtype=compute_dtype, tk=tk)
    return ffn_apply(x, params, tm=tm, weights_resident=weights_resident)


def init_params(key, d_model, dff, dtype=jnp.float32):
    """Deterministic init mimicking torch.nn.Linear's uniform(-1/sqrt(fan_in), ...)."""
    k1, k2, k3, k4 = jax.random.split(key, 4)
    lim1 = 1.0 / (d_model ** 0.5)
    lim2 = 1.0 / (dff ** 0.5)
    # Stored already transposed: W1 (d_model, dff), W2 (dff, d_model)
    w1 = jax.random.uniform(k1, (d_model, dff), dtype, -lim1, lim1)
    b1 = jax.random.uniform(k2, (dff,), dtype, -lim1, lim1)
    w2 = jax.random.uniform(k3, (dff, d_model), dtype, -lim2, lim2)
    b2 = jax.random.uniform(k4, (d_model,), dtype, -lim2, lim2)
    return w1, b1, w2, b2


def _quantized_ref(x, w1, b1, w2, b2):
    """Reference matching the kernel numerics: bf16 matmul inputs, f32 accumulate."""
    xb = x.astype(jnp.bfloat16)
    h = jnp.dot(xb, w1.astype(jnp.bfloat16), preferred_element_type=jnp.float32) + b1
    h = jnp.maximum(h, 0.0)
    return jnp.dot(h.astype(jnp.bfloat16), w2.astype(jnp.bfloat16),
                   preferred_element_type=jnp.float32) + b2


if __name__ == "__main__":
    key = jax.random.PRNGKey(0)
    kx, kp = jax.random.split(key)

    batch, seq, d_model, dff = 2, 8, 32, 64
    x = jax.random.normal(kx, (batch, seq, d_model), jnp.float32)
    w1, b1, w2, b2 = init_params(kp, d_model, dff)

    # 1) resident-weight fast path (auto), f32 activations, prepare-once reuse.
    params = prepare_ffn_params(w1, b1, w2, b2)
    y = jax.block_until_ready(ffn_apply(x, params))
    assert y.shape == (batch, seq, d_model) and y.dtype == x.dtype
    y_ref = _quantized_ref(x, w1, b1, w2, b2)
    assert jnp.allclose(y, y_ref, atol=1e-3, rtol=1e-3), \
        float(jnp.max(jnp.abs(y - y_ref)))
    y_f32 = jnp.maximum(x @ w1 + b1, 0.0) @ w2 + b2
    assert jnp.allclose(y, y_f32, atol=1e-1, rtol=1e-1), \
        float(jnp.max(jnp.abs(y - y_f32)))

    # 2) streamed-weight path (forced): multiple dff tiles accumulated over k.
    d2, f2 = 32, 1024
    w1b, b1b, w2b, b2b = init_params(jax.random.PRNGKey(1), d2, f2)
    xs = jax.random.normal(jax.random.PRNGKey(2), (batch, seq, d2), jnp.float32)
    ys = jax.block_until_ready(
        pointwise_feed_forward(xs, w1b, b1b, w2b, b2b, weights_resident=False))
    ys_ref = _quantized_ref(xs, w1b, b1b, w2b, b2b)
    assert jnp.allclose(ys, ys_ref, atol=1e-2, rtol=1e-2), \
        float(jnp.max(jnp.abs(ys - ys_ref)))

    # 3) bf16 activations: exercises the f32-scratch accumulator + cast store.
    xc = x.astype(jnp.bfloat16)
    yc = jax.block_until_ready(ffn_apply(xc, params))
    assert yc.dtype == jnp.bfloat16
    assert jnp.allclose(yc.astype(jnp.float32), y_ref, atol=6e-2, rtol=6e-2), \
        float(jnp.max(jnp.abs(yc.astype(jnp.float32) - y_ref)))

    print("KERNEL_OK")
</pallas_src>

<mosaic_0001>
module attributes {stable_mosaic.version = 11 : i64} {
  func.func @kernel(%arg0: i32, %arg1: i32, %arg2: memref<16x256xbf16, #tpu.memory_space<vmem>>, %arg3: memref<256x256xbf16, #tpu.memory_space<vmem>>, %arg4: memref<1x256xf32, #tpu.memory_space<vmem>>, %arg5: memref<256x256xbf16, #tpu.memory_space<vmem>>, %arg6: memref<1x256xf32, #tpu.memory_space<vmem>>, %arg7: memref<16x256xf32, #tpu.memory_space<vmem>>) attributes {dimension_semantics = [#tpu.dimension_semantics<parallel>, #tpu.dimension_semantics<arbitrary>], iteration_bounds = array<i64: 1, 1>, scalar_prefetch = 0 : i64, scratch_operands = 0 : i64, tpu.core_type = #tpu.core_type<tc>, window_params = [{transform_indices = @transform_0, window_bounds = array<i64: 16, 256>}, {pipeline_mode = #tpu.pipeline_mode<synchronous>, transform_indices = @transform_1, window_bounds = array<i64: 256, 256>}, {pipeline_mode = #tpu.pipeline_mode<synchronous>, transform_indices = @transform_2, window_bounds = array<i64: 1, 256>}, {pipeline_mode = #tpu.pipeline_mode<synchronous>, transform_indices = @transform_3, window_bounds = array<i64: 256, 256>}, {pipeline_mode = #tpu.pipeline_mode<synchronous>, transform_indices = @transform_4, window_bounds = array<i64: 1, 256>}, {transform_indices = @transform_5, window_bounds = array<i64: 16, 256>}]} {
    %c0_i32 = arith.constant 0 : i32
    %0 = arith.cmpi eq, %arg1, %c0_i32 : i32
    %1 = arith.extui %0 : i1 to i32
    %c0_i32_0 = arith.constant 0 : i32
    %2 = arith.cmpi ne, %1, %c0_i32_0 : i32
    scf.if %2 {
      %cst_13 = arith.constant 0.000000e+00 : f32
      %25 = vector.broadcast %cst_13 : f32 to vector<16x256xf32>
      %c0_14 = arith.constant 0 : index
      %c0_15 = arith.constant 0 : index
      %26 = vector.load %arg7[%c0_14, %c0_15] : memref<16x256xf32, #tpu.memory_space<vmem>>, vector<16x256xf32>
      tpu.vector_store %arg7[%c0_14, %c0_15], %25 {strides = array<i32>} : memref<16x256xf32, #tpu.memory_space<vmem>>, vector<16x256xf32>,
    } else {
    }
    %c256_i32 = arith.constant 256 : i32
    %3 = arith.muli %arg1, %c256_i32 : i32
    %4 = tpu.assume_multiple %3, 256 : i32
    %c0 = arith.constant 0 : index
    %5 = arith.index_cast %4 : i32 to index
    %6 = vector.load %arg3[%c0, %5] : memref<256x256xbf16, #tpu.memory_space<vmem>>, vector<256x256xbf16>
    %c0_1 = arith.constant 0 : index
    %7 = arith.index_cast %4 : i32 to index
    %8 = vector.load %arg4[%c0_1, %7] : memref<1x256xf32, #tpu.memory_space<vmem>>, vector<1x256xf32>
    %9 = arith.index_cast %4 : i32 to index
    %c0_2 = arith.constant 0 : index
    %10 = vector.load %arg5[%9, %c0_2] : memref<256x256xbf16, #tpu.memory_space<vmem>>, vector<256x256xbf16>
    %c0_3 = arith.constant 0 : index
    %c0_4 = arith.constant 0 : index
    %11 = vector.load %arg2[%c0_3, %c0_4] : memref<16x256xbf16, #tpu.memory_space<vmem>>, vector<16x256xbf16>
    %cst = arith.constant dense<0.000000e+00> : vector<16x256xf32>
    %12 = tpu.matmul %11, %6, %cst {dimension_numbers = #tpu.dot_dimension_numbers<[1], [0], [0], [1], [0, 0, 1, 1], [], []>} : vector<16x256xbf16>, vector<256x256xbf16>, vector<16x256xf32> -> vector<16x256xf32>
    %13 = vector.broadcast %8 : vector<1x256xf32> to vector<16x256xf32>
    %14 = arith.addf %12, %13 : vector<16x256xf32>
    %cst_5 = arith.constant 0.000000e+00 : f32
    %15 = vector.broadcast %cst_5 : f32 to vector<16x256xf32>
    %16 = arith.maximumf %14, %15 : vector<16x256xf32>
    %c0_6 = arith.constant 0 : index
    %c0_7 = arith.constant 0 : index
    %17 = vector.load %arg7[%c0_6, %c0_7] : memref<16x256xf32, #tpu.memory_space<vmem>>, vector<16x256xf32>
    %18 = arith.truncf %16 : vector<16x256xf32> to vector<16x256xbf16>
    %cst_8 = arith.constant dense<0.000000e+00> : vector<16x256xf32>
    %19 = tpu.matmul %18, %10, %cst_8 {dimension_numbers = #tpu.dot_dimension_numbers<[1], [0], [0], [1], [0, 0, 1, 1], [], []>} : vector<16x256xbf16>, vector<256x256xbf16>, vector<16x256xf32> -> vector<16x256xf32>
    %20 = arith.addf %17, %19 : vector<16x256xf32>
    %c0_9 = arith.constant 0 : index
    %c0_10 = arith.constant 0 : index
    %21 = vector.load %arg7[%c0_9, %c0_10] : memref<16x256xf32, #tpu.memory_space<vmem>>, vector<16x256xf32>
    tpu.vector_store %arg7[%c0_9, %c0_10], %20 {strides = array<i32>} : memref<16x256xf32, #tpu.memory_space<vmem>>, vector<16x256xf32>,
    %c0_i32_11 = arith.constant 0 : i32
    %22 = arith.cmpi eq, %arg1, %c0_i32_11 : i32
    %23 = arith.extui %22 : i1 to i32
    %c0_i32_12 = arith.constant 0 : i32
    %24 = arith.cmpi ne, %23, %c0_i32_12 : i32
    scf.if %24 {
      %c0_13 = arith.constant 0 : index
      %c0_14 = arith.constant 0 : index
      %25 = vector.load %arg7[%c0_13, %c0_14] : memref<16x256xf32, #tpu.memory_space<vmem>>, vector<16x256xf32>
      %c0_15 = arith.constant 0 : index
      %c0_16 = arith.constant 0 : index
      %26 = vector.load %arg6[%c0_15, %c0_16] : memref<1x256xf32, #tpu.memory_space<vmem>>, vector<1x256xf32>
      %27 = vector.broadcast %26 : vector<1x256xf32> to vector<16x256xf32>
      %28 = arith.addf %25, %27 : vector<16x256xf32>
      %c0_17 = arith.constant 0 : index
      %c0_18 = arith.constant 0 : index
      %29 = vector.load %arg7[%c0_17, %c0_18] : memref<16x256xf32, #tpu.memory_space<vmem>>, vector<16x256xf32>
      tpu.vector_store %arg7[%c0_17, %c0_18], %28 {strides = array<i32>} : memref<16x256xf32, #tpu.memory_space<vmem>>, vector<16x256xf32>,
    } else {
    }
    return
  }
  func.func @transform_0(%arg0: i32, %arg1: i32) -> (i32, i32) {
    %c0_i32 = arith.constant 0 : i32
    %c0_i32_0 = arith.constant 0 : i32
    return %arg0, %c0_i32 : i32, i32
  }
  func.func @transform_1(%arg0: i32, %arg1: i32) -> (i32, i32) {
    %c0_i32 = arith.constant 0 : i32
    %c0_i32_0 = arith.constant 0 : i32
    %c0_i32_1 = arith.constant 0 : i32
    return %c0_i32, %c0_i32_0 : i32, i32
  }
  func.func @transform_2(%arg0: i32, %arg1: i32) -> (i32, i32) {
    %c0_i32 = arith.constant 0 : i32
    %c0_i32_0 = arith.constant 0 : i32
    %c0_i32_1 = arith.constant 0 : i32
    return %c0_i32, %c0_i32_0 : i32, i32
  }
  func.func @transform_3(%arg0: i32, %arg1: i32) -> (i32, i32) {
    %c0_i32 = arith.constant 0 : i32
    %c0_i32_0 = arith.constant 0 : i32
    %c0_i32_1 = arith.constant 0 : i32
    return %c0_i32, %c0_i32_0 : i32, i32
  }
  func.func @transform_4(%arg0: i32, %arg1: i32) -> (i32, i32) {
    %c0_i32 = arith.constant 0 : i32
    %c0_i32_0 = arith.constant 0 : i32
    %c0_i32_1 = arith.constant 0 : i32
    return %c0_i32, %c0_i32_0 : i32, i32
  }
  func.func @transform_5(%arg0: i32, %arg1: i32) -> (i32, i32) {
    %c0_i32 = arith.constant 0 : i32
    %c0_i32_0 = arith.constant 0 : i32
    return %arg0, %c0_i32 : i32, i32
  }
}

</mosaic_0001>

<bundles_post_ra>
// kernel: tpu_custom_call.1
= control target key start
LH: loop header
LB: loop body
LE: loop exit
PB: predicated region body
PF: predicated region fallthrough
CT: control target
= control target key end

     0   :  { %10 = vsyncpa [#allocation3], 0  ;;  %s1019_s0 = inlined_call_operand.hbm [shape: bf16[16,256], index: 0, kind: input, shape index: {}]   ;;  %s1020_s1 = inlined_call_operand.hbm [shape: bf16[256,256], index: 1, kind: input, shape index: {}]   ;;  %s1021_s2 = inlined_call_operand.vmem [shape: f32[1,256], index: 2, kind: input, shape index: {}]   ;;  %s1022_s3 = inlined_call_operand.hbm [shape: bf16[256,256], index: 3, kind: input, shape index: {}]   ;;  %s1023_s4 = inlined_call_operand.vmem [shape: f32[1,256], index: 4, kind: input, shape index: {}]   ;;  %s1024_s5 = inlined_call_operand.hbm [shape: f32[16,256], index: 5, kind: output, shape index: {}]  }
   0x1   :  { %11 = vsyncpa [#allocation6], 0 }
   0x2   :  { %12 = vsyncpa [#allocation4], 0  ;;  %s911_s18 = smov [#allocation5]   ;;  %s912_s20 = smov [#allocation2]  }
   0x3   :  { %s30_s19 = sshll.u32 %s911_s18, 4  ;;  %s18_s21 = sshll.u32 %s912_s20, 4  ;;  %s31_s19 = int_to_ptr.vmem [resolvable:$true] %s30_s19  ;;  %s949_s21 = int_to_ptr.vmem [resolvable:$true] %s18_s21 }
   0x4   :  { %s817_s24 = scalar_lea.hbm %s1020_s1, 4096 }
   0x5   :  { %p818_p0 = scmp.ne.s32.totalorder %s1020_s1, %s817_s24  ;;  %p821_p1 = scmp.lt.u32.totalorder %s817_s24, %s1020_s1 }
   0x7   :  { %p823_p2 = pnand %p821_p1, %p818_p0 }
   0x9   :  { %826 = shalt.err (!%p823_p2)
}
   0xa   :  { %s827_s29 = scalar_lea.vmem %s31_s19, 4096  ;;  %p832_p4 = scmp.lt.s32.totalorder %s31_s19, %s31_s19 }
   0xb   :  { %p828_p3 = scmp.ne.s32.totalorder %s31_s19, %s827_s29  ;;  %p833_p5 = scmp.lt.s32.totalorder %s827_s29, %s827_s29 }
   0xd   :  { %p834_p6 = por %p833_p5, %p832_p4 }
   0xf   :  { %p835_p7 = pnand %p834_p6, %p828_p3 }
  0x11   :  { %838 = shalt.err (!%p835_p7)
}
  0x12   :  { %s913_s30 = smov 128   ;;  %s914_s6 = smov 8  }
  0x13   :  { %36 = dma.hbm_to_vmem [thread:$0]  %s1020_s1, 4096, %s31_s19, [#allocation6], %s913_s30, %s913_s30, %s914_s6  }
  0x14   :  { %s839_s11 = scalar_lea.hbm %s1019_s0, 256 }
  0x15   :  { %p840_p8 = scmp.ne.s32.totalorder %s1019_s0, %s839_s11  ;;  %p843_p9 = scmp.lt.u32.totalorder %s839_s11, %s1019_s0 }
  0x17   :  { %p845_p10 = pnand %p843_p9, %p840_p8 }
  0x19   :  { %848 = shalt.err (!%p845_p10)
}
  0x1a   :  { %s849_s16 = scalar_lea.vmem %s949_s21, 256  ;;  %p854_p12 = scmp.lt.s32.totalorder %s949_s21, %s949_s21 }
  0x1b   :  { %p850_p11 = scmp.ne.s32.totalorder %s949_s21, %s849_s16  ;;  %p855_p13 = scmp.lt.s32.totalorder %s849_s16, %s849_s16 }
  0x1d   :  { %p856_p0 = por %p855_p13, %p854_p12 }
  0x1f   :  { %p857_p1 = pnand %p856_p0, %p850_p11 }
  0x21   :  { %860 = shalt.err (!%p857_p1)
}
  0x22   :  { %24 = dma.hbm_to_vmem [thread:$0]  %s1019_s0, 256, %s949_s21, [#allocation3], %s913_s30, %s913_s30, %s914_s6  }
  0x23   :  { %s915_s18 = smov [#allocation7]   ;;  %s861_s23 = scalar_lea.hbm %s1022_s3, 4096 }
  0x24   :  { %s44_s19 = sshll.u32 %s915_s18, 4  ;;  %p862_p2 = scmp.ne.s32.totalorder %s1022_s3, %s861_s23  ;;  %s45_s19 = int_to_ptr.vmem [resolvable:$true] %s44_s19 }
  0x25   :  { %p865_p3 = scmp.lt.u32.totalorder %s861_s23, %s1022_s3 }
  0x27   :  { %p867_p4 = pnand %p865_p3, %p862_p2 }
  0x29   :  { %870 = shalt.err (!%p867_p4)
}
  0x2a   :  { %s871_s28 = scalar_lea.vmem %s45_s19, 4096  ;;  %p876_p6 = scmp.lt.s32.totalorder %s45_s19, %s45_s19 }
  0x2b   :  { %p872_p5 = scmp.ne.s32.totalorder %s45_s19, %s871_s28  ;;  %p877_p7 = scmp.lt.s32.totalorder %s871_s28, %s871_s28 }
  0x2d   :  { %p878_p8 = por %p877_p7, %p876_p6 }
  0x2f   :  { %p879_p9 = pnand %p878_p8, %p872_p5 }
  0x31   :  { %882 = shalt.err (!%p879_p9)
}
  0x32   :  { %50 = dma.hbm_to_vmem [thread:$0]  %s1022_s3, 4096, %s45_s19, [#allocation6], %s913_s30, %s913_s30, %s914_s6  }
  0x33   :  { %905 = dma.done.wait [#allocation3], 256  }
  0x34   :  { %906 = vsyncadd [#allocation3], 4294967040 }
  0x35   :  { %907 = dma.done.wait [#allocation6], 8192  }
  0x36   :  { %908 = vsyncadd [#allocation6], 4294959104  ;;  %v718_v0 = vld [vmem:[#allocation5 + $0x4] ss:$8 sps:$4 sm:$0xff]   ;;  %v720_v1 = vld [vmem:[#allocation5] ss:$8 sps:$4 sm:$0xff]  }
  0x37   :  { %329 = vmatprep.subr.bf16.mxu0 %v718_v0  ;;  %v721_v2 = vld [vmem:[#allocation5 + $0x14] ss:$8 sps:$4 sm:$0xff]   ;;  %v723_v3 = vld [vmem:[#allocation5 + $0x10] ss:$8 sps:$4 sm:$0xff]   ;;  %v724_v4 = vld [vmem:[#allocation5 + $0x24] ss:$8 sps:$4 sm:$0xff]  }
  0x38   :  { %330 = vmatpush1.bf16.msra.mxu0 %v720_v1  ;;  %v726_v5 = vld [vmem:[#allocation5 + $0x20] ss:$8 sps:$4 sm:$0xff]   ;;  %v727_v6 = vld [vmem:[#allocation5 + $0x34] ss:$8 sps:$4 sm:$0xff]   ;;  %v729_v7 = vld [vmem:[#allocation5 + $0x30] ss:$8 sps:$4 sm:$0xff]  }
  0x39   :  { %331 = vmatprep.subr.bf16.mxu0 %v721_v2  ;;  %v730_v8 = vld [vmem:[#allocation5 + $0x44] ss:$8 sps:$4 sm:$0xff]   ;;  %v732_v9 = vld [vmem:[#allocation5 + $0x40] ss:$8 sps:$4 sm:$0xff]   ;;  %v733_v10 = vld [vmem:[#allocation5 + $0x54] ss:$8 sps:$4 sm:$0xff]   ;;  %v149_v2 = vlaneseq }
  0x3a   :  { %v735_v11 = vld [vmem:[#allocation5 + $0x50] ss:$8 sps:$4 sm:$0xff]   ;;  %v736_v12 = vld [vmem:[#allocation5 + $0x64] ss:$8 sps:$4 sm:$0xff]   ;;  %v738_v13 = vld [vmem:[#allocation5 + $0x60] ss:$8 sps:$4 sm:$0xff]  }
  0x3b   :  { %v739_v14 = vld [vmem:[#allocation5 + $0x74] ss:$8 sps:$4 sm:$0xff]   ;;  %v769_v16 = vld [vmem:[#allocation7 + $0x4] ss:$8 sps:$4 sm:$0xff]   ;;  %v771_v17 = vld [vmem:[#allocation7] ss:$8 sps:$4 sm:$0xff]  }
  0x3c   :  { %332 = vmatpush1.bf16.msra.mxu0 %v723_v3  ;;  %v768_v15 = vld [vmem:[#allocation2 + $0x4] ss:$8 sps:$4 sm:$0xff]   ;;  %542 = vmatprep.subr.bf16.mxu1 %v769_v16  ;;  %v774_v19 = vld [vmem:[#allocation7 + $0x10] ss:$8 sps:$4 sm:$0xff]   ;;  %v775_v21 = vld [vmem:[#allocation7 + $0x24] ss:$8 sps:$4 sm:$0xff]  }
  0x3d   :  { %333 = vmatprep.subr.bf16.mxu0 %v724_v4  ;;  %361 = vmatprep.mubr.bf16.mxu0 %v768_v15  ;;  %v772_v18 = vld [vmem:[#allocation7 + $0x14] ss:$8 sps:$4 sm:$0xff]   ;;  %v741_v20 = vld [vmem:[#allocation5 + $0x70] ss:$8 sps:$4 sm:$0xff]   ;;  %v742_v22 = vld [vmem:[#allocation5 + $0x84] ss:$8 sps:$4 sm:$0xff]  }
  0x3e   :  { %543 = vmatpush1.bf16.msra.mxu1 %v771_v17  ;;  %v777_v23 = vld [vmem:[#allocation7 + $0x20] ss:$8 sps:$4 sm:$0xff]   ;;  %v778_v25 = vld [vmem:[#allocation7 + $0x34] ss:$8 sps:$4 sm:$0xff]   ;;  %v780_v27 = vld [vmem:[#allocation7 + $0x30] ss:$8 sps:$4 sm:$0xff]  }
  0x3f   :  { %544 = vmatprep.subr.bf16.mxu1 %v772_v18  ;;  %v744_v24 = vld [vmem:[#allocation5 + $0x80] ss:$8 sps:$4 sm:$0xff]   ;;  %v745_v26 = vld [vmem:[#allocation5 + $0x94] ss:$8 sps:$4 sm:$0xff]   ;;  %v747_v28 = vld [vmem:[#allocation5 + $0x90] ss:$8 sps:$4 sm:$0xff]  }
  0x40   :  { %334 = vmatpush1.bf16.msra.mxu0 %v726_v5  ;;  %v781_v29 = vld [vmem:[#allocation7 + $0x44] ss:$8 sps:$4 sm:$0xff]   ;;  %v783_v31 = vld [vmem:[#allocation7 + $0x40] ss:$8 sps:$4 sm:$0xff]   ;;  %v784_v33 = vld [vmem:[#allocation7 + $0x54] ss:$8 sps:$4 sm:$0xff]  }
  0x41   :  { %335 = vmatprep.subr.bf16.mxu0 %v727_v6  ;;  %v748_v30 = vld [vmem:[#allocation5 + $0xa4] ss:$8 sps:$4 sm:$0xff]   ;;  %v750_v32 = vld [vmem:[#allocation5 + $0xa0] ss:$8 sps:$4 sm:$0xff]   ;;  %v751_v34 = vld [vmem:[#allocation5 + $0xb4] ss:$8 sps:$4 sm:$0xff]  }
  0x42   :  { %545 = vmatpush1.bf16.msra.mxu1 %v774_v19  ;;  %v786_v35 = vld [vmem:[#allocation7 + $0x50] ss:$8 sps:$4 sm:$0xff]   ;;  %v787_v37 = vld [vmem:[#allocation7 + $0x64] ss:$8 sps:$4 sm:$0xff]   ;;  %v789_v39 = vld [vmem:[#allocation7 + $0x60] ss:$8 sps:$4 sm:$0xff]  }
  0x43   :  { %546 = vmatprep.subr.bf16.mxu1 %v775_v21  ;;  %v753_v36 = vld [vmem:[#allocation5 + $0xb0] ss:$8 sps:$4 sm:$0xff]   ;;  %v754_v38 = vld [vmem:[#allocation5 + $0xc4] ss:$8 sps:$4 sm:$0xff]   ;;  %v756_v40 = vld [vmem:[#allocation5 + $0xc0] ss:$8 sps:$4 sm:$0xff]  }
  0x44   :  { %336 = vmatpush1.bf16.msra.mxu0 %v729_v7  ;;  %v790_v41 = vld [vmem:[#allocation7 + $0x74] ss:$8 sps:$4 sm:$0xff]   ;;  %v792_v43 = vld [vmem:[#allocation7 + $0x70] ss:$8 sps:$4 sm:$0xff]   ;;  %v793_v45 = vld [vmem:[#allocation7 + $0x84] ss:$8 sps:$4 sm:$0xff]  }
  0x45   :  { %337 = vmatprep.subr.bf16.mxu0 %v730_v8  ;;  %v757_v42 = vld [vmem:[#allocation5 + $0xd4] ss:$8 sps:$4 sm:$0xff]   ;;  %v759_v44 = vld [vmem:[#allocation5 + $0xd0] ss:$8 sps:$4 sm:$0xff]   ;;  %v760_v46 = vld [vmem:[#allocation5 + $0xe4] ss:$8 sps:$4 sm:$0xff]  }
  0x46   :  { %547 = vmatpush1.bf16.msra.mxu1 %v777_v23  ;;  %v795_v47 = vld [vmem:[#allocation7 + $0x80] ss:$8 sps:$4 sm:$0xff]   ;;  %v796_v49 = vld [vmem:[#allocation7 + $0x94] ss:$8 sps:$4 sm:$0xff]   ;;  %v798_v51 = vld [vmem:[#allocation7 + $0x90] ss:$8 sps:$4 sm:$0xff]  }
  0x47   :  { %548 = vmatprep.subr.bf16.mxu1 %v778_v25  ;;  %v762_v48 = vld [vmem:[#allocation5 + $0xe0] ss:$8 sps:$4 sm:$0xff]   ;;  %v763_v50 = vld [vmem:[#allocation5 + $0xf4] ss:$8 sps:$4 sm:$0xff]   ;;  %v765_v52 = vld [vmem:[#allocation5 + $0xf0] ss:$8 sps:$4 sm:$0xff]  }
  0x48   :  { %338 = vmatpush1.bf16.msra.mxu0 %v732_v9  ;;  %v799_v53 = vld [vmem:[#allocation7 + $0xa4] ss:$8 sps:$4 sm:$0xff]   ;;  %v766_v54 = vld [vmem:[#allocation2] ss:$8 sps:$4 sm:$0xff]   ;;  %v801_v55 = vld [vmem:[#allocation7 + $0xa0] ss:$8 sps:$4 sm:$0xff]  }
  0x49   :  { %339 = vmatprep.subr.bf16.mxu0 %v733_v10  ;;  %v802_v56 = vld [vmem:[#allocation7 + $0xb4] ss:$8 sps:$4 sm:$0xff]   ;;  %v804_v57 = vld [vmem:[#allocation7 + $0xb0] ss:$8 sps:$4 sm:$0xff]   ;;  %v805_v58 = vld [vmem:[#allocation7 + $0xc4] ss:$8 sps:$4 sm:$0xff]  }
  0x4a   :  { %549 = vmatpush1.bf16.msra.mxu1 %v780_v27  ;;  %v807_v59 = vld [vmem:[#allocation7 + $0xc0] ss:$8 sps:$4 sm:$0xff]   ;;  %v808_v60 = vld [vmem:[#allocation7 + $0xd4] ss:$8 sps:$4 sm:$0xff]   ;;  %v810_v61 = vld [vmem:[#allocation7 + $0xd0] ss:$8 sps:$4 sm:$0xff]  }
  0x4b   :  { %550 = vmatprep.subr.bf16.mxu1 %v781_v29  ;;  %v811_v62 = vld [vmem:[#allocation7 + $0xe4] ss:$8 sps:$4 sm:$0xff]   ;;  %v813_v63 = vld [vmem:[#allocation7 + $0xe0] ss:$8 sps:$4 sm:$0xff]   ;;  %v814_v0 = vld [vmem:[#allocation7 + $0xf4] ss:$8 sps:$4 sm:$0xff]  }
  0x4c   :  { %340 = vmatpush1.bf16.msra.mxu0 %v735_v11  ;;  %v816_v1 = vld [vmem:[#allocation7 + $0xf0] ss:$8 sps:$4 sm:$0xff]   ;;  %v150_v3 = vshrl.u32 %v149_v2, 7  ;;  %s916_s6 = smov [#allocation8]  }
  0x4d   :  { %341 = vmatprep.subr.bf16.mxu0 %v736_v12  ;;  %v108_v5 = vld [vmem:[%s1021_s2] sm:$0x3]  ;;  %s625_s7 = sshll.u32 %s916_s6, 4  ;;  %s626_s7 = int_to_ptr.vmem [resolvable:$true] %s625_s7 }
  0x4e   :  { %551 = vmatpush1.bf16.msra.mxu1 %v783_v31  ;;  %v151_v4 = vsub.s32 0, %v150_v3  ;;  %v155_v6 = vsub.s32 1, %v150_v3  ;;  %v600_v23 = vld [vmem:[%s1023_s4] sm:$0x3]  ;;  %s883_s8 = scalar_lea.vmem %s626_s7, 512  ;;  %p888_p11 = scmp.lt.s32.totalorder %s626_s7, %s626_s7 }
  0x4f   :  { %552 = vmatprep.subr.bf16.mxu1 %v784_v33  ;;  %p884_p10 = scmp.ne.s32.totalorder %s626_s7, %s883_s8  ;;  %p889_p12 = scmp.lt.s32.totalorder %s883_s8, %s883_s8 }
  0x50   :  { %342 = vmatpush1.bf16.msra.mxu0 %v738_v13  ;;  %v152_v7 = vrot.slane %v108_v5, %v151_v4  ;;  %v156_v8 = vrot.slane %v108_v5, %v155_v6  ;;  %v609_v25 = vrot.slane %v600_v23, %v155_v6 }
  0x51   :  { %343 = vmatprep.subr.bf16.mxu0 %v739_v14  ;;  %p890_p13 = por %p889_p12, %p888_p11 }
  0x52   :  { %553 = vmatpush1.bf16.msra.mxu1 %v786_v35 }
  0x53   :  { %554 = vmatprep.subr.bf16.mxu1 %v787_v37  ;;  %p891_p0 = pnand %p890_p13, %p884_p10 }
  0x54   :  { %344 = vmatpush1.bf16.msra.mxu0 %v741_v20 }
  0x55   :  { %345 = vmatprep.subr.bf16.mxu0 %v742_v22 }
  0x56   :  { %555 = vmatpush1.bf16.msra.mxu1 %v789_v39 }
  0x57   :  { %556 = vmatprep.subr.bf16.mxu1 %v790_v41 }
  0x58   :  { %346 = vmatpush1.bf16.msra.mxu0 %v744_v24  ;;  %v605_v24 = vrot.slane %v600_v23, %v151_v4 }
  0x59   :  { %347 = vmatprep.subr.bf16.mxu0 %v745_v26 }
  0x5a   :  { %557 = vmatpush1.bf16.msra.mxu1 %v792_v43 }
  0x5b   :  { %558 = vmatprep.subr.bf16.mxu1 %v793_v45 }
  0x5c   :  { %348 = vmatpush1.bf16.msra.mxu0 %v747_v28 }
  0x5d   :  { %349 = vmatprep.subr.bf16.mxu0 %v748_v30 }
  0x5e   :  { %559 = vmatpush1.bf16.msra.mxu1 %v795_v47 }
  0x5f   :  { %560 = vmatprep.subr.bf16.mxu1 %v796_v49 }
  0x60   :  { %350 = vmatpush1.bf16.msra.mxu0 %v750_v32 }
  0x61   :  { %351 = vmatprep.subr.bf16.mxu0 %v751_v34 }
  0x62   :  { %561 = vmatpush1.bf16.msra.mxu1 %v798_v51 }
  0x63   :  { %562 = vmatprep.subr.bf16.mxu1 %v799_v53 }
  0x64   :  { %352 = vmatpush1.bf16.msra.mxu0 %v753_v36 }
  0x65   :  { %353 = vmatprep.subr.bf16.mxu0 %v754_v38 }
  0x66   :  { %563 = vmatpush1.bf16.msra.mxu1 %v801_v55 }
  0x67   :  { %564 = vmatprep.subr.bf16.mxu1 %v802_v56 }
  0x68   :  { %354 = vmatpush1.bf16.msra.mxu0 %v756_v40 }
  0x69   :  { %355 = vmatprep.subr.bf16.mxu0 %v757_v42 }
  0x6a   :  { %565 = vmatpush1.bf16.msra.mxu1 %v804_v57 }
  0x6b   :  { %566 = vmatprep.subr.bf16.mxu1 %v805_v58 }
  0x6c   :  { %356 = vmatpush1.bf16.msra.mxu0 %v759_v44 }
  0x6d   :  { %357 = vmatprep.subr.bf16.mxu0 %v760_v46 }
  0x6e   :  { %567 = vmatpush1.bf16.msra.mxu1 %v807_v59 }
  0x6f   :  { %568 = vmatprep.subr.bf16.mxu1 %v808_v60 }
  0x70   :  { %358 = vmatpush1.bf16.msra.mxu0 %v762_v48 }
  0x71   :  { %359 = vmatprep.subr.bf16.mxu0 %v763_v50 }
  0x72   :  { %569 = vmatpush1.bf16.msra.mxu1 %v810_v61 }
  0x73   :  { %570 = vmatprep.subr.bf16.mxu1 %v811_v62 }
  0x74   :  { %360 = vmatpush1.bf16.msra.mxu0 %v765_v52 }
  0x76   :  { %571 = vmatpush1.bf16.msra.mxu1 %v813_v63 }
  0x77   :  { %362 = vmatmul.mubr.bf16.vlgmr.msra.gmra.mrb[0].mxu0 %v766_v54  ;;  %572 = vmatprep.subr.bf16.mxu1 %v814_v0 }
  0x7a   :  { %573 = vmatpush1.bf16.msra.mxu1 %v816_v1 }
 0x14a   :  { %v363_v9 = vpop.f32.mrb[0].mxu0 }
 0x14b   :  { %v364_v10 = vadd.f32 %v363_v9, %v152_v7  ;;  %v365_v11 = vpop.f32.mrb[1].mxu0 }
 0x14c   :  { %v366_v12 = vadd.f32 %v365_v11, %v156_v8  ;;  %v367_v13 = vpop.f32.mrb[2].mxu0 }
 0x14d   :  { %v368_v14 = vadd.f32 %v367_v13, %v152_v7  ;;  %v369_v15 = vpop.f32.mrb[3].mxu0  ;;  %v372_v17 = vmax.f32 %v364_v10, 0.0 }
 0x14e   :  { %v370_v16 = vadd.f32 %v369_v15, %v156_v8  ;;  %v373_v19 = vmax.f32 %v366_v12, 0.0 }
 0x14f   :  { %v374_v18 = vmax.f32 %v368_v14, 0.0 }
 0x150   :  { %v375_v20 = vmax.f32 %v370_v16, 0.0 }
 0x151   :  { %v380_v21 = vpack.c.bf16 %v374_v18, %v372_v17 }
 0x152   :  { %v381_v22 = vpack.c.bf16 %v375_v20, %v373_v19 }
 0x154   :  { %574 = vmatprep.mubr.bf16.mxu1 %v381_v22 }
 0x155   :  { %575 = vmatmul.mubr.bf16.vlgmr.msra.gmra.mrb[0].mxu1 %v380_v21 }
 0x228   :  { %v576_v26 = vpop.f32.mrb[0].mxu1 }
 0x229   :  { %v578_v27 = vpop.f32.mrb[1].mxu1  ;;  %v612_v29 = vadd.f32 %v605_v24, %v576_v26 }
 0x22a   :  { %v580_v28 = vpop.f32.mrb[2].mxu1  ;;  %v613_v31 = vadd.f32 %v609_v25, %v578_v27 }
 0x22b   :  { %v582_v30 = vpop.f32.mrb[3].mxu1  ;;  %616 = vst [vmem:[#allocation8] sm:$0xff] %v612_v29  ;;  %v614_v32 = vadd.f32 %v605_v24, %v580_v28 }
 0x22c   :  { %617 = vst [vmem:[#allocation8 + $0x8] sm:$0xff] %v613_v31  ;;  %v615_v33 = vadd.f32 %v609_v25, %v582_v30 }
 0x22d   :  { %618 = vst [vmem:[#allocation8 + $0x10] sm:$0xff] %v614_v32 }
 0x22e   :  { %619 = vst [vmem:[#allocation8 + $0x18] sm:$0xff] %v615_v33 }
 0x22f   :  { %894 = shalt.err (!%p891_p0)
}
 0x230   :  { %s895_s10 = scalar_lea.hbm %s1024_s5, 512 }
 0x231   :  { %p896_p1 = scmp.ne.s32.totalorder %s1024_s5, %s895_s10  ;;  %p899_p2 = scmp.lt.u32.totalorder %s895_s10, %s1024_s5 }
 0x233   :  { %p901_p3 = pnand %p899_p2, %p896_p1 }
 0x235   :  { %904 = shalt.err (!%p901_p3)
}
 0x236   :  { %s917_s15 = smov 256   ;;  %s918_s16 = smov 16  }
 0x237   :  { %631 = dma.vmem_to_hbm [thread:$0]  %s626_s7, 512, %s1024_s5, [#allocation4], %s917_s15, %s917_s15, %s918_s16  }
 0x238   :  { %909 = dma.done.wait [#allocation4], 512  }
 0x239   :  { %910 = vsyncadd [#allocation4], 4294966784 }
 0x23a   :  { %635 = vsyncpa [#allocation3], 1 }
 0x23b   :  { %636 = vsyncpa [#allocation6], 1 }
 0x23c   :  { %637 = vsyncpa [#allocation4], 1 }

</bundles_post_ra>
